<compile_context>
chip_gen: v6e
topology: v6e:2x2x1
jax: 0.10.0
libtpu: 0.0.40
codegen_flags: <defaults>
</compile_context>

<pallas_src>
import functools

import jax
import jax.numpy as jnp
from jax.experimental import pallas as pl
from jax.experimental.pallas import tpu as pltpu


def se_kernel(x_ref, w1_ref, w2_ref, o_ref, acc_ref, *, hw, block_hw):
    k = pl.program_id(1)
    last_k = pl.num_programs(1) - 1

    @pl.when(k == 0)
    def _():
        acc_ref[...] = jnp.zeros_like(acc_ref)

    x = x_ref[...].astype(jnp.float32)            # (block_n, C, block_hw)

    if hw % block_hw != 0:
        # Only the final HW tile is padded; mask only there so the steady-state
        # step stays pure vld + vadd + lane-reduce (no per-vreg iota/select).
        @pl.when(k < last_k)
        def _():
            acc_ref[...] += jnp.sum(x, axis=-1)

        @pl.when(k == last_k)
        def _():
            lane = jax.lax.broadcasted_iota(jnp.int32, x.shape, 2)
            xm = jnp.where(k * block_hw + lane < hw, x, 0.0)
            acc_ref[...] += jnp.sum(xm, axis=-1)
    else:
        acc_ref[...] += jnp.sum(x, axis=-1)

    # Finalize once per batch block: mean, tiny MLP, sigmoid gate + skip.
    @pl.when(k == last_k)
    def _():
        pooled = acc_ref[...] * jnp.float32(1.0 / hw)          # (block_n, C)
        h = jnp.dot(pooled, w1_ref[...], preferred_element_type=jnp.float32)
        h = jnp.maximum(h, 0.0)                                # (block_n, C//8)
        s = jnp.dot(h, w2_ref[...], preferred_element_type=jnp.float32)
        s = jax.nn.sigmoid(s)                                  # (block_n, C)
        out = (s * pooled + pooled).astype(o_ref.dtype)        # (block_n, C)
        o_ref[...] = out[:, None, :]                           # (block_n, 1, C)


def _vmem_capacity_bytes():
    try:
        return int(pltpu.get_tpu_info().vmem_capacity_bytes)
    except Exception:
        return 64 << 20          # conservative (v7x-sized) fallback


def _choose_blocks(N, C, HW, itemsize, vmem_cap):
    """Pick (block_n, block_hw): the largest streamed x tile the generation's
    VMEM comfortably allows (the pipeline double-buffers it)."""
    small_vmem = vmem_cap <= (64 << 20)            # v7x: 64 MiB per TC
    max_tile_bytes = (8 << 20) if small_vmem else (16 << 20)

    row_bytes = C * HW * itemsize                  # one full batch row
    if row_bytes <= max_tile_bytes:
        # Whole spatial extent fits in one tile: no HW tiling / no masking.
        # Grow the batch block instead to amortize grid-step overhead and fill
        # the MXU M dimension of the finalize matmuls.
        block_hw = HW
        block_n = int(min(N, max(1, max_tile_bytes // row_bytes)))
        return block_n, block_hw

    # Large spatial extent: one batch row per block, tile HW (no lane cap).
    block_n = 1
    t = (max_tile_bytes // (C * itemsize)) // 128 * 128
    # Keep per-channel contiguous DMA runs >= ~2 KiB even for very large C.
    t = max(t, 512)
    # TODO(synk): for C >= ~8K, tile the channel dim instead of shrinking the
    # per-channel run further (keeps DMA descriptor count / VMEM in check).
    if t < HW and HW % t != 0:
        # Prefer a nearby multiple of 128 that divides HW so the remainder
        # mask never has to run.
        for cand in range(t, max(t // 2, 128) - 1, -128):
            if HW % cand == 0:
                t = cand
                break
    return block_n, int(min(t, HW))


def se_forward(x_nchw, w1, w2, *, block_n=None, block_hw=None):
    """x_nchw: (N, C, H, W); w1: (C//8, C), w2: (C, C//8) (PyTorch layouts)."""
    N, C, H, W = x_nchw.shape
    hidden = w1.shape[0]
    HW = H * W
    x_flat = x_nchw.reshape(N, C, HW)
    itemsize = x_flat.dtype.itemsize

    # Pre-transpose the (tiny) weights so the kernel does y = x @ W row-major.
    w1_t = jnp.transpose(w1)  # (C, hidden)
    w2_t = jnp.transpose(w2)  # (hidden, C)

    vmem_cap = _vmem_capacity_bytes()
    auto_n, auto_hw = _choose_blocks(N, C, HW, itemsize, vmem_cap)
    if block_n is None:
        block_n = auto_n
    if block_hw is None:
        block_hw = auto_hw
    block_n = int(min(block_n, N))
    block_hw = int(min(block_hw, HW))

    num_n = pl.cdiv(N, block_n)
    num_k = pl.cdiv(HW, block_hw)

    # VMEM budget: double-buffered x stream + (conservatively double-buffered)
    # resident weights + output tile + accumulator scratch + slack, clamped to
    # a generation-aware cap (64 MiB parts vs 128 MiB parts).
    x_tile = block_n * C * block_hw * itemsize
    w_bytes = C * hidden * (w1_t.dtype.itemsize + w2_t.dtype.itemsize)
    o_tile = block_n * C * x_flat.dtype.itemsize
    need = 2 * x_tile + 2 * w_bytes + 2 * o_tile + block_n * C * 4 + (2 << 20)
    cap = (52 << 20) if vmem_cap <= (64 << 20) else (100 << 20)
    vmem_limit = int(min(max(need, 16 << 20), cap))

    cost = pl.CostEstimate(
        flops=int(N * C * HW + 4 * N * C * hidden + 3 * N * C),
        transcendentals=int(N * C),
        bytes_accessed=int(x_flat.size * itemsize + N * C * itemsize + w_bytes),
    )

    out3 = pl.pallas_call(
        functools.partial(se_kernel, hw=HW, block_hw=block_hw),
        out_shape=jax.ShapeDtypeStruct((N, 1, C), x_nchw.dtype),
        grid_spec=pltpu.PrefetchScalarGridSpec(
            num_scalar_prefetch=0,
            grid=(num_n, num_k),
            in_specs=[
                pl.BlockSpec((block_n, C, block_hw), lambda n, k: (n, 0, k)),
                pl.BlockSpec((C, hidden), lambda n, k: (0, 0)),   # resident weight
                pl.BlockSpec((hidden, C), lambda n, k: (0, 0)),   # resident weight
            ],
            out_specs=pl.BlockSpec((block_n, 1, C), lambda n, k: (n, 0, 0)),
            scratch_shapes=[pltpu.VMEM((block_n, C), jnp.float32)],
        ),
        compiler_params=pltpu.CompilerParams(
            dimension_semantics=("parallel", "arbitrary"),
            vmem_limit_bytes=vmem_limit,
        ),
        cost_estimate=cost,
    )(x_flat, w1_t, w2_t)
    # NOTE: PyTorch's .squeeze() would also drop the batch dim when N == 1;
    # this wrapper always returns (N, C) and assumes 4-D NCHW input (the
    # ndim <= 3 passthrough branch of the module is an interface concern).
    return out3.reshape(N, C)


def se_reference(x_nchw, w1, w2):
    pooled = jnp.mean(x_nchw, axis=(2, 3))               # (N, C)
    h = jnp.maximum(pooled @ w1.T, 0.0)                  # (N, C//8)
    s = jax.nn.sigmoid(h @ w2.T)                         # (N, C)
    return s * pooled + pooled


if __name__ == "__main__":
    key = jax.random.PRNGKey(0)
    kx, k1, k2, kx2, kx3 = jax.random.split(key, 5)

    # Small shapes consistent with the module (in_ch must be a multiple of 8).
    N, C, H, W = 2, 32, 16, 16
    hidden = C // 8
    bound1 = 1.0 / (C ** 0.5)
    bound2 = 1.0 / (hidden ** 0.5)
    x = jax.random.normal(kx, (N, C, H, W), dtype=jnp.float32)
    w1 = jax.random.uniform(k1, (hidden, C), jnp.float32, -bound1, bound1)
    w2 = jax.random.uniform(k2, (C, hidden), jnp.float32, -bound2, bound2)

    out = jax.block_until_ready(se_forward(x, w1, w2))
    ref = se_reference(x, w1, w2)
    assert out.shape == (N, C)
    assert jnp.allclose(out, ref, atol=1e-5, rtol=1e-4), "mismatch vs reference"

    # Exercise the multi-tile HW streaming path with a masked remainder tile
    # (HW = 400, block_hw = 128 -> 4 HW steps, only the last one masked).
    x2 = jax.random.normal(kx2, (N, C, 20, 20), dtype=jnp.float32)
    out2 = jax.block_until_ready(se_forward(x2, w1, w2, block_n=1, block_hw=128))
    ref2 = se_reference(x2, w1, w2)
    assert jnp.allclose(out2, ref2, atol=1e-5, rtol=1e-4), "mismatch (tiled HW path)"

    # Exercise a padded batch block (N = 3 with block_n = 2: second block is
    # partially out of bounds; padded rows are computed but never written back).
    x3 = jax.random.normal(kx3, (3, C, 16, 16), dtype=jnp.float32)
    out3 = jax.block_until_ready(se_forward(x3, w1, w2, block_n=2))
    ref3 = se_reference(x3, w1, w2)
    assert out3.shape == (3, C)
    assert jnp.allclose(out3, ref3, atol=1e-5, rtol=1e-4), "mismatch (padded batch block)"

    print("KERNEL_OK")
</pallas_src>

<mosaic_0001>
module attributes {stable_mosaic.version = 11 : i64} {
  func.func @se_kernel(%arg0: i32, %arg1: i32, %arg2: memref<2x32x256xf32, #tpu.memory_space<vmem>>, %arg3: memref<32x4xf32, #tpu.memory_space<vmem>>, %arg4: memref<4x32xf32, #tpu.memory_space<vmem>>, %arg5: memref<2x1x32xf32, #tpu.memory_space<vmem>>, %arg6: memref<2x32xf32, #tpu.memory_space<vmem>>) attributes {dimension_semantics = [#tpu.dimension_semantics<parallel>, #tpu.dimension_semantics<arbitrary>], iteration_bounds = array<i64: 1, 1>, scalar_prefetch = 0 : i64, scratch_operands = 1 : i64, tpu.core_type = #tpu.core_type<tc>, window_params = [{transform_indices = @transform_0, window_bounds = array<i64: 2, 32, 256>}, {pipeline_mode = #tpu.pipeline_mode<synchronous>, transform_indices = @transform_1, window_bounds = array<i64: 32, 4>}, {pipeline_mode = #tpu.pipeline_mode<synchronous>, transform_indices = @transform_2, window_bounds = array<i64: 4, 32>}, {transform_indices = @transform_3, window_bounds = array<i64: 2, 1, 32>}]} {
    %c0_i32 = arith.constant 0 : i32
    %0 = arith.cmpi eq, %arg1, %c0_i32 : i32
    %1 = arith.extui %0 : i1 to i32
    %c0_i32_0 = arith.constant 0 : i32
    %2 = arith.cmpi ne, %1, %c0_i32_0 : i32
    scf.if %2 {
      %cst_9 = arith.constant 0.000000e+00 : f32
      %11 = vector.broadcast %cst_9 : f32 to vector<2x32xf32>
      %c0_10 = arith.constant 0 : index
      %c0_11 = arith.constant 0 : index
      %12 = vector.load %arg6[%c0_10, %c0_11] : memref<2x32xf32, #tpu.memory_space<vmem>>, vector<2x32xf32>
      tpu.vector_store %arg6[%c0_10, %c0_11], %11 {strides = array<i32>} : memref<2x32xf32, #tpu.memory_space<vmem>>, vector<2x32xf32>,
    } else {
    }
    %c0 = arith.constant 0 : index
    %c0_1 = arith.constant 0 : index
    %c0_2 = arith.constant 0 : index
    %3 = vector.load %arg2[%c0, %c0_1, %c0_2] : memref<2x32x256xf32, #tpu.memory_space<vmem>>, vector<2x32x256xf32>
    %c0_3 = arith.constant 0 : index
    %c0_4 = arith.constant 0 : index
    %4 = vector.load %arg6[%c0_3, %c0_4] : memref<2x32xf32, #tpu.memory_space<vmem>>, vector<2x32xf32>
    %cst = arith.constant dense<0.000000e+00> : vector<2x32xf32>
    %5 = vector.multi_reduction <add>, %3, %cst [2] : vector<2x32x256xf32> to vector<2x32xf32>
    %6 = arith.addf %4, %5 : vector<2x32xf32>
    %c0_5 = arith.constant 0 : index
    %c0_6 = arith.constant 0 : index
    %7 = vector.load %arg6[%c0_5, %c0_6] : memref<2x32xf32, #tpu.memory_space<vmem>>, vector<2x32xf32>
    tpu.vector_store %arg6[%c0_5, %c0_6], %6 {strides = array<i32>} : memref<2x32xf32, #tpu.memory_space<vmem>>, vector<2x32xf32>,
    %c0_i32_7 = arith.constant 0 : i32
    %8 = arith.cmpi eq, %arg1, %c0_i32_7 : i32
    %9 = arith.extui %8 : i1 to i32
    %c0_i32_8 = arith.constant 0 : i32
    %10 = arith.cmpi ne, %9, %c0_i32_8 : i32
    scf.if %10 {
      %c0_9 = arith.constant 0 : index
      %c0_10 = arith.constant 0 : index
      %11 = vector.load %arg6[%c0_9, %c0_10] : memref<2x32xf32, #tpu.memory_space<vmem>>, vector<2x32xf32>
      %cst_11 = arith.constant 3.906250e-03 : f32
      %12 = vector.broadcast %cst_11 : f32 to vector<2x32xf32>
      %13 = arith.mulf %11, %12 : vector<2x32xf32>
      %c0_12 = arith.constant 0 : index
      %c0_13 = arith.constant 0 : index
      %14 = vector.load %arg3[%c0_12, %c0_13] : memref<32x4xf32, #tpu.memory_space<vmem>>, vector<32x4xf32>
      %cst_14 = arith.constant dense<0.000000e+00> : vector<2x4xf32>
      %15 = tpu.matmul %13, %14, %cst_14 {dimension_numbers = #tpu.dot_dimension_numbers<[1], [0], [0], [1], [0, 0, 1, 1], [], []>} : vector<2x32xf32>, vector<32x4xf32>, vector<2x4xf32> -> vector<2x4xf32>
      %cst_15 = arith.constant 0.000000e+00 : f32
      %16 = vector.broadcast %cst_15 : f32 to vector<2x4xf32>
      %17 = arith.maximumf %15, %16 : vector<2x4xf32>
      %c0_16 = arith.constant 0 : index
      %c0_17 = arith.constant 0 : index
      %18 = vector.load %arg4[%c0_16, %c0_17] : memref<4x32xf32, #tpu.memory_space<vmem>>, vector<4x32xf32>
      %cst_18 = arith.constant dense<0.000000e+00> : vector<2x32xf32>
      %19 = tpu.matmul %17, %18, %cst_18 {dimension_numbers = #tpu.dot_dimension_numbers<[1], [0], [0], [1], [0, 0, 1, 1], [], []>} : vector<2x4xf32>, vector<4x32xf32>, vector<2x32xf32> -> vector<2x32xf32>
      %20 = arith.negf %19 : vector<2x32xf32>
      %21 = math.exp %20 : vector<2x32xf32>
      %cst_19 = arith.constant 1.000000e+00 : f32
      %22 = vector.broadcast %cst_19 : f32 to vector<2x32xf32>
      %23 = arith.addf %22, %21 : vector<2x32xf32>
      %24 = arith.divf %22, %23 : vector<2x32xf32>
      %25 = arith.mulf %24, %13 : vector<2x32xf32>
      %26 = arith.addf %25, %13 : vector<2x32xf32>
      %27 = vector.shape_cast %26 : vector<2x32xf32> to vector<2x1x32xf32>
      %c0_20 = arith.constant 0 : index
      %c0_21 = arith.constant 0 : index
      %c0_22 = arith.constant 0 : index
      %28 = vector.load %arg5[%c0_20, %c0_21, %c0_22] : memref<2x1x32xf32, #tpu.memory_space<vmem>>, vector<2x1x32xf32>
      tpu.vector_store %arg5[%c0_20, %c0_21, %c0_22], %27 {strides = array<i32>} : memref<2x1x32xf32, #tpu.memory_space<vmem>>, vector<2x1x32xf32>,
    } else {
    }
    return
  }
  func.func @transform_0(%arg0: i32, %arg1: i32) -> (i32, i32, i32) {
    %c0_i32 = arith.constant 0 : i32
    %c0_i32_0 = arith.constant 0 : i32
    return %arg0, %c0_i32, %arg1 : i32, i32, i32
  }
  func.func @transform_1(%arg0: i32, %arg1: i32) -> (i32, i32) {
    %c0_i32 = arith.constant 0 : i32
    %c0_i32_0 = arith.constant 0 : i32
    %c0_i32_1 = arith.constant 0 : i32
    return %c0_i32, %c0_i32_0 : i32, i32
  }
  func.func @transform_2(%arg0: i32, %arg1: i32) -> (i32, i32) {
    %c0_i32 = arith.constant 0 : i32
    %c0_i32_0 = arith.constant 0 : i32
    %c0_i32_1 = arith.constant 0 : i32
    return %c0_i32, %c0_i32_0 : i32, i32
  }
  func.func @transform_3(%arg0: i32, %arg1: i32) -> (i32, i32, i32) {
    %c0_i32 = arith.constant 0 : i32
    %c0_i32_0 = arith.constant 0 : i32
    %c0_i32_1 = arith.constant 0 : i32
    return %arg0, %c0_i32, %c0_i32_0 : i32, i32, i32
  }
}

</mosaic_0001>

<bundles_post_ra>
// kernel: tpu_custom_call.1
= control target key start
LH: loop header
LB: loop body
LE: loop exit
PB: predicated region body
PF: predicated region fallthrough
CT: control target
= control target key end

     0   :  { %8 = vsyncpa [#allocation4], 0  ;;  %s489_s0 = inlined_call_operand.hbm [shape: f32[2,32,256], index: 0, kind: input, shape index: {}]   ;;  %s490_s1 = inlined_call_operand.vmem [shape: f32[32,4], index: 1, kind: input, shape index: {}]   ;;  %s491_s2 = inlined_call_operand.vmem [shape: f32[4,32], index: 2, kind: input, shape index: {}]   ;;  %s492_s3 = inlined_call_operand.hbm [shape: f32[2,1,32], index: 3, kind: output, shape index: {}]  }
   0x1   :  { %9 = vsyncpa [#allocation5], 0  ;;  %s435_s12 = smov [#allocation3]  }
   0x2   :  { %s15_s13 = sshll.u32 %s435_s12, 4  ;;  %s16_s13 = int_to_ptr.vmem [resolvable:$true] %s15_s13 }
   0x3   :  { %s399_s14 = scalar_lea.vmem %s16_s13, 2048  ;;  %p404_p1 = scmp.lt.s32.totalorder %s16_s13, %s16_s13 }
   0x4   :  { %p400_p0 = scmp.ne.s32.totalorder %s16_s13, %s399_s14  ;;  %p405_p2 = scmp.lt.s32.totalorder %s399_s14, %s399_s14 }
   0x6   :  { %p406_p3 = por %p405_p2, %p404_p1 }
   0x8   :  { %p407_p4 = pnand %p406_p3, %p400_p0 }
   0xa   :  { %410 = shalt.err (!%p407_p4)
}
   0xb   :  { %s436_s15 = smov 256   ;;  %s437_s16 = smov 16  }
   0xc   :  { %21 = dma.hbm_to_vmem [thread:$0]  %s489_s0, 2048, %s16_s13, [#allocation4], %s436_s15, %s436_s15, %s437_s16  }
   0xd   :  { %431 = dma.done.wait [#allocation4], 2048  }
   0xe   :  { %432 = vsyncadd [#allocation4], 4294965248  ;;  %v43_v0 = vld [vmem:[#allocation3 + $0x40] sm:$0xff]  ;;  %v44_v1 = vld [vmem:[#allocation3 + $0x48] sm:$0xff]  ;;  %vm33_vm0 = vcmask 254976   ;;  %v438_v24 = vmov 0.0   ;;  %v84_v29 = vlaneseq }
   0xf   :  { %v35_v2 = vld [vmem:[#allocation3] sm:$0xff]  ;;  %v64_v3 = vadd.f32 %v44_v1, %v43_v0  ;;  %v36_v4 = vld [vmem:[#allocation3 + $0x8] sm:$0xff]  ;;  %v45_v5 = vld [vmem:[#allocation3 + $0x50] sm:$0xff]  ;;  %34 = vst.msk [vmem:[#allocation2] sm:$0x3] %vm33_vm0, %v438_v24  ;;  %363 = vmatprep.subr.mxu0 %v438_v24  ;;  %374 = vmatprep.subr.mxu1 %v438_v24  ;;  %vm439_vm1 = vmmov 0  }
  0x10   :  { %v46_v6 = vld [vmem:[#allocation3 + $0x58] sm:$0xff]  ;;  %v52_v7 = vadd.f32 %v36_v4, %v35_v2  ;;  %v37_v8 = vld [vmem:[#allocation3 + $0x10] sm:$0xff]  ;;  %v47_v12 = vld [vmem:[#allocation3 + $0x60] sm:$0xff]  ;;  %371 = vmatprep.mubr.msk.f32.mxu0 %vm439_vm1, %v438_v24  ;;  %376 = vmatprep.mubr.msk.f32.mxu1 %vm439_vm1, %v438_v24  ;;  %v85_v30 = vand.u32 127, %v84_v29  ;;  %v87_v35 = vshrl.u32 %v84_v29, 7  ;;  %vm95_vm2 = vcmask 130112  }
  0x11   :  { %v38_v9 = vld [vmem:[#allocation3 + $0x18] sm:$0xff]  ;;  %65 = vadd.xlane.f32.xlu1 %v64_v3  ;;  %v67_v10 = vadd.f32 %v46_v6, %v45_v5  ;;  %v48_v13 = vld [vmem:[#allocation3 + $0x68] sm:$0xff]  ;;  %v39_v14 = vld [vmem:[#allocation3 + $0x20] sm:$0xff]  ;;  %vm102_vm3 = vcmask 195712   ;;  %vm109_vm4 = vcmask 261312   ;;  %vm130_vm5 = vcmask 1041409  }
  0x12   :  { %53 = vadd.xlane.f32.xlu0 %v52_v7  ;;  %v55_v11 = vadd.f32 %v38_v9, %v37_v8  ;;  %v40_v15 = vld [vmem:[#allocation3 + $0x28] sm:$0xff]  ;;  %v70_v16 = vadd.f32 %v48_v13, %v47_v12  ;;  %v49_v18 = vld [vmem:[#allocation3 + $0x70] sm:$0xff]  ;;  %v50_v19 = vld [vmem:[#allocation3 + $0x78] sm:$0xff]  ;;  %v90_v33 = vadd.s32 4294967288, %v85_v30  ;;  %v97_v34 = vadd.s32 4294967280, %v85_v30 }
  0x13   :  { %v58_v17 = vadd.f32 %v40_v15, %v39_v14  ;;  %v41_v20 = vld [vmem:[#allocation3 + $0x30] sm:$0xff]  ;;  %v42_v21 = vld [vmem:[#allocation3 + $0x38] sm:$0xff]  ;;  %v73_v22 = vadd.f32 %v50_v19, %v49_v18  ;;  %v142_v27 = vld [vmem:[%s490_s1 + $0x8] sm:$0xff]  ;;  %v104_v39 = vadd.s32 4294967272, %v85_v30  ;;  %v88_v41 = vsub.s32 %v85_v30, %v87_v35 }
  0x14   :  { %v61_v23 = vadd.f32 %v42_v21, %v41_v20  ;;  %v144_v25 = vld [vmem:[%s490_s1 + $0x18] sm:$0xff]  ;;  %v143_v26 = vld [vmem:[%s490_s1 + $0x10] sm:$0xff]  ;;  %v141_v28 = vld [vmem:[%s490_s1] sm:$0xff]  ;;  %v93_v37 = vsub.s32 %v90_v33, %v87_v35  ;;  %v100_v40 = vsub.s32 %v97_v34, %v87_v35  ;;  %vm145_vm6 = vcmask 261120  }
  0x15   :  { %68 = vadd.xlane.f32.xlu1 %v67_v10  ;;  %364 = vmatpush3.msra.mxu0 %v144_v25  ;;  %v107_v45 = vsub.s32 %v104_v39, %v87_v35  ;;  %v220_v2 = vld [vmem:[%s491_s2] sm:$0xf]  ;;  %vm225_vm7 = vcmask 1043456   ;;  %vm221_vm8 = vcmask 31744   ;;  %vm332_vm9 = vcmask 253952   ;;  %s441_s2 = smov [#allocation6]  }
  0x16   :  { %56 = vadd.xlane.f32.xlu0 %v55_v11  ;;  %365 = vmatprep.subr.mxu0 %v438_v24  ;;  %v51_v60 = vld [vmem:[#allocation2] sm:$0x3]  ;;  %v440_v11 = vmov 1966171168   ;;  %s340_s27 = sshll.u32 %s441_s2, 4  ;;  %s341_s27 = int_to_ptr.vmem [resolvable:$true] %s340_s27 }
  0x17   :  { %366 = vmatpush3.msra.mxu0 %v143_v26  ;;  %375 = vmatpush3.msk.msra.mxu1 %vm225_vm7, %v220_v2  ;;  %v309_v12 = vunpack.c.l.s4 %v440_v11  ;;  %s411_s28 = scalar_lea.vmem %s341_s27, 32  ;;  %p416_p6 = scmp.lt.s32.totalorder %s341_s27, %s341_s27 }
  0x18   :  { %367 = vmatprep.subr.mxu0 %v438_v24  ;;  %p412_p5 = scmp.ne.s32.totalorder %s341_s27, %s411_s28  ;;  %p417_p7 = scmp.lt.s32.totalorder %s411_s28, %s411_s28 }
  0x19   :  { %71 = vadd.xlane.f32.xlu1 %v70_v16  ;;  %368 = vmatpush3.msra.mxu0 %v142_v27  ;;  %v310_v13 = vunpack.c.0.s8 %v309_v12 }
  0x1a   :  { %59 = vadd.xlane.f32.xlu0 %v58_v17  ;;  %369 = vmatprep.subr.mxu0 %v438_v24  ;;  %p418_p8 = por %p417_p7, %p416_p6 }
  0x1b   :  { %370 = vmatpush3.msra.mxu0 %v141_v28  ;;  %v313_v16 = vsub.s32 %v310_v13, %v87_v35 }
  0x1c   :  { %p419_p9 = pnand %p418_p8, %p412_p5 }
  0x1d   :  { %74 = vadd.xlane.f32.xlu1 %v73_v22 }
  0x1e   :  { %62 = vadd.xlane.f32.xlu0 %v61_v23 }
  0x9a   :  { %v66_v31 = vpop.xlane.xlu1 %65 }
  0x9b   :  { %v54_v32 = vpop.xlane.xlu0 %53  ;;  %v114_v48 = vrot.slane %v66_v31, %v88_v41 }
  0x9c   :  { %v89_v50 = vrot.slane %v54_v32, %v88_v41 }
  0x9e   :  { %v69_v36 = vpop.xlane.xlu1 %68 }
  0x9f   :  { %v57_v38 = vpop.xlane.xlu0 %56  ;;  %v118_v43 = vrot.slane %v69_v36, %v93_v37 }
  0xa0   :  { %v94_v46 = vrot.slane %v57_v38, %v93_v37 }
  0xa1   :  { %v119_v52 = vsel %vm95_vm2, %v118_v43, %v114_v48 }
  0xa2   :  { %v72_v42 = vpop.xlane.xlu1 %71  ;;  %v96_v55 = vsel %vm95_vm2, %v94_v46, %v89_v50 }
  0xa3   :  { %v60_v44 = vpop.xlane.xlu0 %59  ;;  %v123_v47 = vrot.slane %v72_v42, %v100_v40 }
  0xa4   :  { %v101_v49 = vrot.slane %v60_v44, %v100_v40 }
  0xa5   :  { %v124_v56 = vsel %vm102_vm3, %v123_v47, %v119_v52 }
  0xa6   :  { %v75_v51 = vpop.xlane.xlu1 %74  ;;  %v103_v58 = vsel %vm102_vm3, %v101_v49, %v96_v55 }
  0xa7   :  { %v128_v53 = vrot.slane %v75_v51, %v107_v45  ;;  %v63_v54 = vpop.xlane.xlu0 %62 }
  0xa8   :  { %v108_v57 = vrot.slane %v63_v54, %v107_v45 }
  0xa9   :  { %v129_v59 = vsel %vm109_vm4, %v128_v53, %v124_v56 }
  0xaa   :  { %v110_v61 = vsel %vm109_vm4, %v108_v57, %v103_v58 }
  0xab   :  { %v131_v62 = vsel %vm130_vm5, %v129_v59, %v110_v61 }
  0xac   :  { %v133_v63 = vadd.f32 %v131_v62, %v51_v60 }
  0xae   :  { %135 = vst.msk [vmem:[#allocation2] sm:$0x3] %vm33_vm0, %v133_v63 }
  0xb5   :  { %v139_v0 = vld [vmem:[#allocation2] sm:$0x3] }
  0xb6   :  { %v140_v1 = vmul.f32 0.00390625, %v139_v0 }
  0xb8   :  { %372 = vmatmul.mubr.msk.f32.vlgmr.msra.gmra.mxu0 %vm145_vm6, %v140_v1 }
 0x178   :  { %v215_v3 = vpop.f32.mrf.mxu0 }
 0x179   :  { %v219_v4 = vmax.f32 %v215_v3, 0.0 }
 0x17a   :  { %v373_v5 = vpop.f32.mrf.mxu0 }
 0x17b   :  { %377 = vmatmul.mubr.msk.f32.vlgmr.msra.gmra.mxu1 %vm221_vm8, %v219_v4 }
 0x23b   :  { %v295_v6 = vpop.f32.mrf.mxu1 }
 0x23c   :  { %v355_v7 = vmul.f32 -1.442695, %v295_v6 }
 0x23d   :  { %v378_v8 = vpop.f32.mrf.mxu1 }
 0x23e   :  { %387 = vpow2.f32 %v355_v7 }
 0x24b   :  { %v388_v9 = vpop.eup %387 }
 0x24c   :  { %v302_v10 = vadd.f32 1.0, %v388_v9 }
 0x24e   :  { %389 = vrcp.f32 %v302_v10 }
 0x25b   :  { %v390_v14 = vpop.eup %389 }
 0x25c   :  { %v305_v15 = vmul.f32 %v390_v14, %v140_v1 }
 0x25e   :  { %v306_v17 = vadd.f32 %v305_v15, %v140_v1 }
 0x260   :  { %v314_v18 = vrot.slane %v306_v17, %v313_v16 }
 0x262   :  { %v315_v19 = vcombine.high %v314_v18, %v314_v18  ;;  %v322_v20 = vrot.slane %v314_v18, %v313_v16 }
 0x264   :  { %v329_v21 = vrot.slane %v315_v19, %v313_v16  ;;  %333 = vst.msk [vmem:[#allocation6] sm:$0x1] %vm332_vm9, %v322_v20 }
 0x266   :  { %334 = vst.msk [vmem:[#allocation6 + $0x1] sm:$0x1] %vm332_vm9, %v329_v21 }
 0x267   :  { %422 = shalt.err (!%p419_p9)
}
 0x268   :  { %s442_s29 = smov 1  }
 0x269   :  { %346 = dma.vmem_to_hbm [thread:$0]  %s341_s27, 32, %s492_s3, [#allocation5], %s437_s16, %s437_s16, %s442_s29  }
 0x26a   :  { %433 = dma.done.wait [#allocation5], 32  }
 0x26b   :  { %434 = vsyncadd [#allocation5], 4294967264 }
 0x26c   :  { %350 = vsyncpa [#allocation4], 1 }
 0x26d   :  { %351 = vsyncpa [#allocation5], 1 }

</bundles_post_ra>
